<compile_context>
chip_gen: v7x
topology: tpu7x:2x2x1
jax: 0.10.0
libtpu: 0.0.40
codegen_flags: <defaults>
</compile_context>

<pallas_src>
import functools

import jax
import jax.numpy as jnp
from jax.experimental import pallas as pl
from jax.experimental.pallas import tpu as pltpu

TILE_B_MAX = 128 * 1024   # rows per grid step at large B (~2.5 MiB x buffer)
TILE_B_MIN = 8 * 1024     # don't shrink tiles below this (per-step overhead)
PALLAS_MIN_BATCH = 2048   # below this, plain XLA fusion beats a custom kernel


def _round_up(n, m):
    return (n + m - 1) // m * m


def mlp_kernel(x_ref, w1_ref, b1_ref, w2c_ref, b2_ref, o_ref):
    # x arrives row-major (tile_b, 5).  Upcast narrow transfer dtypes (bf16)
    # to f32 right after load: v5e's VPU/EUP have no bf16, and f32 keeps the
    # math matching the reference.
    x = x_ref[...].astype(jnp.float32)                        # (tile_b, 5)

    # fc1: W1 @ x^T -> (5, tile_b).  Contracting dim 1 of both operands keeps
    # the feature-major relayout on-chip (MXU consumes the transposed operand)
    # instead of paying a wrapper-side HBM transpose of x.
    h = jax.lax.dot_general(
        w1_ref[...], x, (((1,), (1,)), ((), ())),
        preferred_element_type=jnp.float32)                   # (5, tile_b)
    h = jax.nn.sigmoid(h + b1_ref[...])                       # lane-dense VPU/EUP

    # fc2 (M=1, K=5): broadcast-multiply + sublane reduction -- no MXU latency
    # / result-FIFO pops for a K=5 matmul; VALU/XLU slots are idle anyway.
    y = jnp.sum(w2c_ref[...] * h, axis=0, keepdims=True) + b2_ref[...]  # (1, tile_b)
    o_ref[...] = y.astype(o_ref.dtype)


@functools.partial(jax.jit, static_argnames=("force_pallas", "tile_b"))
def net_forward(x, w1, b1, w2, b2, *, force_pallas=False, tile_b=None):
    """x: (B, 5) f32/bf16.  w1: (5,5), b1: (5,), w2: (1,5), b2: (1,) (PyTorch Linear layout)."""
    B, F = x.shape
    assert F == 5

    # Small-batch fallback: the pallas_call fixed cost dwarfs the work there.
    if B < PALLAS_MIN_BATCH and not force_pallas:
        h = jax.nn.sigmoid(x.astype(jnp.float32) @ w1.T + b1)
        return (h @ w2.T + b2).astype(x.dtype)

    if tile_b is None:
        b128 = _round_up(B, 128)
        if b128 <= TILE_B_MIN:
            tile_b = b128
        else:
            # >= 4 grid steps (keeps both v7x TensorCores fed) without letting
            # tiles shrink into overhead-bound territory or past TILE_B_MAX.
            tile_b = min(TILE_B_MAX, max(TILE_B_MIN, _round_up(-(-b128 // 4), 128)))
    assert tile_b % 128 == 0

    # No padding of x: cdiv grid with a partial edge block (<=127 wasted rows).
    n_tiles = pl.cdiv(B, tile_b)

    w1_f32 = w1.astype(jnp.float32)
    b1_col = b1.reshape(5, 1).astype(jnp.float32)
    w2_col = w2.reshape(5, 1).astype(jnp.float32)   # w2_col[k, 0] == w2[0, k]
    b2_col = b2.reshape(1, 1).astype(jnp.float32)

    out_fm = pl.pallas_call(
        mlp_kernel,
        out_shape=jax.ShapeDtypeStruct((1, B), x.dtype),
        grid=(n_tiles,),
        in_specs=[
            pl.BlockSpec((tile_b, 5), lambda i: (i, 0)),   # x: row-major batch tiles
            pl.BlockSpec((5, 5), lambda i: (0, 0)),        # W1: VMEM-resident
            pl.BlockSpec((5, 1), lambda i: (0, 0)),        # b1
            pl.BlockSpec((5, 1), lambda i: (0, 0)),        # w2 column
            pl.BlockSpec((1, 1), lambda i: (0, 0)),        # b2
        ],
        out_specs=pl.BlockSpec((1, tile_b), lambda i: (0, i)),
        compiler_params=pltpu.CompilerParams(
            # Batch axis is embarrassingly parallel -> both TCs on v7x.
            dimension_semantics=("parallel",),
            # ~15 MiB worst case (128K-row tile, double-buffered) << 32 MiB.
            vmem_limit_bytes=32 * 1024 * 1024,
        ),
    )(x, w1_f32, b1_col, w2_col, b2_col)

    # (1, B) -> (B, 1): single non-unit dim, no real data movement.
    return out_fm.T


def net_forward_ref(x, w1, b1, w2, b2):
    h = jax.nn.sigmoid(x.astype(jnp.float32) @ w1.T + b1)
    return h @ w2.T + b2


if __name__ == "__main__":
    key = jax.random.PRNGKey(0)
    k_x, k_w1, k_b1, k_w2, k_b2 = jax.random.split(key, 5)

    # Deterministic parameters (shapes of Linear(5,5) and Linear(5,1)).
    w1 = jax.random.normal(k_w1, (5, 5), dtype=jnp.float32) * 0.3
    b1 = jax.random.normal(k_b1, (5,), dtype=jnp.float32) * 0.1
    w2 = jax.random.normal(k_w2, (1, 5), dtype=jnp.float32) * 0.3
    b2 = jax.random.normal(k_b2, (1,), dtype=jnp.float32) * 0.1

    # 1) Small batch, single (partial) tile -- force the Pallas path.
    B = 8
    x = jax.random.normal(k_x, (B, 5), dtype=jnp.float32)
    out = net_forward(x, w1, b1, w2, b2, force_pallas=True)
    jax.block_until_ready(out)
    ref = net_forward_ref(x, w1, b1, w2, b2)
    assert out.shape == (B, 1)
    assert jnp.allclose(out, ref, atol=1e-5, rtol=1e-5)

    # 2) Multi-tile grid with a partial edge block (300 = 2*128 + 44 rows).
    x300 = jax.random.normal(jax.random.PRNGKey(1), (300, 5), dtype=jnp.float32)
    out300 = net_forward(x300, w1, b1, w2, b2, force_pallas=True, tile_b=128)
    jax.block_until_ready(out300)
    ref300 = net_forward_ref(x300, w1, b1, w2, b2)
    assert out300.shape == (300, 1)
    assert jnp.allclose(out300, ref300, atol=1e-5, rtol=1e-5)

    # 3) Narrow-transfer (bf16 input) path -- looser tolerance by design.
    out_bf16 = net_forward(x.astype(jnp.bfloat16), w1, b1, w2, b2, force_pallas=True)
    jax.block_until_ready(out_bf16)
    assert jnp.allclose(out_bf16.astype(jnp.float32), ref, atol=5e-2, rtol=5e-2)

    print("KERNEL_OK")
</pallas_src>

<mosaic_0001>
module attributes {stable_mosaic.version = 11 : i64} {
  func.func @mlp_kernel(%arg0: i32, %arg1: memref<128x5xf32, #tpu.memory_space<vmem>>, %arg2: memref<5x5xf32, #tpu.memory_space<vmem>>, %arg3: memref<5x1xf32, #tpu.memory_space<vmem>>, %arg4: memref<5x1xf32, #tpu.memory_space<vmem>>, %arg5: memref<1x1xf32, #tpu.memory_space<vmem>>, %arg6: memref<1x128xf32, #tpu.memory_space<vmem>>) attributes {dimension_semantics = [#tpu.dimension_semantics<parallel>], iteration_bounds = array<i64: 1>, scalar_prefetch = 0 : i64, scratch_operands = 0 : i64, tpu.core_type = #tpu.core_type<tc>, window_params = [{transform_indices = @transform_0, window_bounds = array<i64: 128, 5>}, {pipeline_mode = #tpu.pipeline_mode<synchronous>, transform_indices = @transform_1, window_bounds = array<i64: 5, 5>}, {pipeline_mode = #tpu.pipeline_mode<synchronous>, transform_indices = @transform_2, window_bounds = array<i64: 5, 1>}, {pipeline_mode = #tpu.pipeline_mode<synchronous>, transform_indices = @transform_3, window_bounds = array<i64: 5, 1>}, {pipeline_mode = #tpu.pipeline_mode<synchronous>, transform_indices = @transform_4, window_bounds = array<i64: 1, 1>}, {transform_indices = @transform_5, window_bounds = array<i64: 1, 128>}]} {
    %c0 = arith.constant 0 : index
    %c0_0 = arith.constant 0 : index
    %0 = vector.load %arg1[%c0, %c0_0] : memref<128x5xf32, #tpu.memory_space<vmem>>, vector<128x5xf32>
    %c0_1 = arith.constant 0 : index
    %c0_2 = arith.constant 0 : index
    %1 = vector.load %arg2[%c0_1, %c0_2] : memref<5x5xf32, #tpu.memory_space<vmem>>, vector<5x5xf32>
    %cst = arith.constant dense<0.000000e+00> : vector<5x128xf32>
    %2 = tpu.matmul %1, %0, %cst {dimension_numbers = #tpu.dot_dimension_numbers<[1], [1], [0], [0], [0, 0, 1, 0], [], []>} : vector<5x5xf32>, vector<128x5xf32>, vector<5x128xf32> -> vector<5x128xf32>
    %c0_3 = arith.constant 0 : index
    %c0_4 = arith.constant 0 : index
    %3 = vector.load %arg3[%c0_3, %c0_4] : memref<5x1xf32, #tpu.memory_space<vmem>>, vector<5x1xf32>
    %4 = vector.broadcast %3 : vector<5x1xf32> to vector<5x128xf32>
    %5 = arith.addf %2, %4 : vector<5x128xf32>
    %6 = arith.negf %5 : vector<5x128xf32>
    %7 = math.exp %6 : vector<5x128xf32>
    %cst_5 = arith.constant 1.000000e+00 : f32
    %8 = vector.broadcast %cst_5 : f32 to vector<5x128xf32>
    %9 = arith.addf %8, %7 : vector<5x128xf32>
    %10 = arith.divf %8, %9 : vector<5x128xf32>
    %c0_6 = arith.constant 0 : index
    %c0_7 = arith.constant 0 : index
    %11 = vector.load %arg4[%c0_6, %c0_7] : memref<5x1xf32, #tpu.memory_space<vmem>>, vector<5x1xf32>
    %12 = vector.broadcast %11 : vector<5x1xf32> to vector<5x128xf32>
    %13 = arith.mulf %12, %10 : vector<5x128xf32>
    %cst_8 = arith.constant dense<0.000000e+00> : vector<128xf32>
    %14 = vector.multi_reduction <add>, %13, %cst_8 [0] : vector<5x128xf32> to vector<128xf32>
    %15 = vector.shape_cast %14 : vector<128xf32> to vector<1x128xf32>
    %c0_9 = arith.constant 0 : index
    %c0_10 = arith.constant 0 : index
    %16 = vector.load %arg5[%c0_9, %c0_10] : memref<1x1xf32, #tpu.memory_space<vmem>>, vector<1x1xf32>
    %17 = vector.broadcast %16 : vector<1x1xf32> to vector<1x128xf32>
    %18 = arith.addf %15, %17 : vector<1x128xf32>
    %c0_11 = arith.constant 0 : index
    %c0_12 = arith.constant 0 : index
    %19 = vector.load %arg6[%c0_11, %c0_12] : memref<1x128xf32, #tpu.memory_space<vmem>>, vector<1x128xf32>
    tpu.vector_store %arg6[%c0_11, %c0_12], %18 {strides = array<i32>} : memref<1x128xf32, #tpu.memory_space<vmem>>, vector<1x128xf32>,
    return
  }
  func.func @transform_0(%arg0: i32) -> (i32, i32) {
    %c0_i32 = arith.constant 0 : i32
    %c0_i32_0 = arith.constant 0 : i32
    return %arg0, %c0_i32 : i32, i32
  }
  func.func @transform_1(%arg0: i32) -> (i32, i32) {
    %c0_i32 = arith.constant 0 : i32
    %c0_i32_0 = arith.constant 0 : i32
    %c0_i32_1 = arith.constant 0 : i32
    return %c0_i32, %c0_i32_0 : i32, i32
  }
  func.func @transform_2(%arg0: i32) -> (i32, i32) {
    %c0_i32 = arith.constant 0 : i32
    %c0_i32_0 = arith.constant 0 : i32
    %c0_i32_1 = arith.constant 0 : i32
    return %c0_i32, %c0_i32_0 : i32, i32
  }
  func.func @transform_3(%arg0: i32) -> (i32, i32) {
    %c0_i32 = arith.constant 0 : i32
    %c0_i32_0 = arith.constant 0 : i32
    %c0_i32_1 = arith.constant 0 : i32
    return %c0_i32, %c0_i32_0 : i32, i32
  }
  func.func @transform_4(%arg0: i32) -> (i32, i32) {
    %c0_i32 = arith.constant 0 : i32
    %c0_i32_0 = arith.constant 0 : i32
    %c0_i32_1 = arith.constant 0 : i32
    return %c0_i32, %c0_i32_0 : i32, i32
  }
  func.func @transform_5(%arg0: i32) -> (i32, i32) {
    %c0_i32 = arith.constant 0 : i32
    %c0_i32_0 = arith.constant 0 : i32
    return %c0_i32, %arg0 : i32, i32
  }
}

</mosaic_0001>

<bundles_post_ra>
// kernel: net_forward.1
= control target key start
LH: loop header
LB: loop body
LE: loop exit
PB: predicated region body
PF: predicated region fallthrough
CT: control target
= control target key end

     0   :  { %s482_s0 = inlined_call_operand.vmem [shape: f32[8,5], index: 0, kind: input, shape index: {}]   ;;  %s483_s1 = inlined_call_operand.vmem [shape: f32[5,5], index: 1, kind: input, shape index: {}]   ;;  %s484_s2 = inlined_call_operand.vmem [shape: f32[5,1], index: 2, kind: input, shape index: {}]   ;;  %s485_s3 = inlined_call_operand.vmem [shape: f32[5,1], index: 3, kind: input, shape index: {}]   ;;  %s486_s4 = inlined_call_operand.<no memory space> [shape: f32[1,1], index: 4, kind: input, shape index: {}]   ;;  %s487_s5 = inlined_call_operand.hbm [shape: f32[1,8], index: 5, kind: output, shape index: {}]  }
   0x1   :  { %v10_v0 = vstv %s486_s4 }
   0x2   :  { %11 = vst [vmem:[#allocation2] sm:$0x1] %v10_v0 }
   0x3   :  { %v23_v1 = vld [vmem:[%s482_s0] sm:$0xff]  ;;  %v24_v2 = vld [vmem:[%s482_s0 + $0x8] sm:$0xff]  ;;  %vm46_vm0 = vcmask 39936   ;;  %v352_v3 = vmov 0.0|0.0   ;;  %vm353_vm2 = vmmov 0   ;;  %v354_v6 = vmov 0.0  }
   0x4   :  { %285 = vmatprep.subr.bf16.mxu0 %v352_v3  ;;  %v286_v4 = vpack.c.bf16 %v24_v2, %v23_v1  ;;  %vm398_vm1 = vmpackc.low %vm46_vm0, %vm46_vm0  ;;  %282 = vmatprep.mubr.msk.f32.mxu0 %vm353_vm2, %v354_v6  ;;  %v355_v7 = vmov 0   ;;  %v25_v8 = vld [vmem:[%s482_s0 + $0x10] sm:$0xff]  ;;  %v26_v9 = vld [vmem:[%s482_s0 + $0x18] sm:$0xff] }
   0x5   :  { %322 = vset.pattern.permute.xlu0 %v355_v7  ;;  %323 = vset.pattern.permute.xlu1 %v355_v7  ;;  %v40_v10 = vld [vmem:[%s484_s2] sm:$0x1f]  ;;  %v290_v12 = vpack.c.bf16 %v26_v9, %v25_v8 }
   0x6   :  { %288 = vmatpush3.bf16.xpose.msk.msra.mxu0 %vm398_vm1, %v286_v4  ;;  %43 = vperm.xlu0 %322, %v40_v10  }
   0x7   :  { %289 = vmatprep.subr.bf16.mxu0 %v352_v3 }
   0x9   :  { %v189_v11 = vld [vmem:[#allocation2] sm:$0x1] }
   0xa   :  { %192 = vperm.xlu1 %323, %v189_v11  }
   0xb   :  { %12 = vsyncpa [#allocation4], 0  ;;  %v174_v13 = vld [vmem:[%s485_s3] sm:$0x1f]  ;;  %v28_v15 = vld [vmem:[%s482_s0 + $0x28] sm:$0xff]  ;;  %v195_v42 = vlaneseq  ;;  %vm181_vm3 = vcmask 1044480  }
   0xc   :  { %177 = vperm.xlu0 %322, %v174_v13   ;;  %v27_v14 = vld [vmem:[%s482_s0 + $0x20] sm:$0xff]  ;;  %v29_v17 = vld [vmem:[%s482_s0 + $0x30] sm:$0xff]  ;;  %v30_v18 = vld [vmem:[%s482_s0 + $0x38] sm:$0xff] }
   0xd   :  { %v294_v16 = vpack.c.bf16 %v28_v15, %v27_v14  ;;  %v298_v19 = vpack.c.bf16 %v30_v18, %v29_v17  ;;  %v31_v20 = vld [vmem:[%s482_s0 + $0x40] sm:$0xff]  ;;  %v32_v21 = vld [vmem:[%s482_s0 + $0x48] sm:$0xff]  ;;  %v33_v23 = vld [vmem:[%s482_s0 + $0x50] sm:$0xff]  ;;  %v196_v45 = vshrl.u32 %v195_v42, 7 }
   0xe   :  { %292 = vmatpush3.bf16.xpose.msk.msra.mxu0 %vm398_vm1, %v290_v12  ;;  %v302_v22 = vpack.c.bf16 %v32_v21, %v31_v20  ;;  %v34_v24 = vld [vmem:[%s482_s0 + $0x58] sm:$0xff]  ;;  %v35_v26 = vld [vmem:[%s482_s0 + $0x60] sm:$0xff]  ;;  %v36_v27 = vld [vmem:[%s482_s0 + $0x68] sm:$0xff] }
   0xf   :  { %293 = vmatprep.subr.bf16.mxu0 %v352_v3  ;;  %v306_v25 = vpack.c.bf16 %v34_v24, %v33_v23  ;;  %v310_v28 = vpack.c.bf16 %v36_v27, %v35_v26  ;;  %v37_v29 = vld [vmem:[%s482_s0 + $0x70] sm:$0xff]  ;;  %v38_v30 = vld [vmem:[%s482_s0 + $0x78] sm:$0xff]  ;;  %v39_v32 = vld [vmem:[%s483_s1] sm:$0x1f]  ;;  %v197_v48 = vsub.s32 0, %v196_v45  ;;  %s356_s0 = smov [#allocation3]  }
  0x10   :  { %v314_v31 = vpack.c.bf16 %v38_v30, %v37_v29  ;;  %s207_s1 = sshll.u32 %s356_s0, 4  ;;  %s208_s1 = int_to_ptr.vmem [resolvable:$true] %s207_s1 }
  0x11   :  { %s328_s29 = scalar_lea.vmem %s208_s1, 16  ;;  %s332_s30 = scalar_lea.vmem %s208_s1, 32 }
  0x12   :  { %p329_p0 = scmp.ne.s32.totalorder %s208_s1, %s328_s29  ;;  %p333_p1 = scmp.lt.s32.totalorder %s208_s1, %s208_s1 }
  0x13   :  { %p334_p2 = scmp.lt.s32.totalorder %s332_s30, %s328_s29 }
  0x15   :  { %p335_p3 = por %p334_p2, %p333_p1 }
  0x16   :  { %296 = vmatpush3.bf16.xpose.msk.msra.mxu0 %vm398_vm1, %v294_v16 }
  0x17   :  { %297 = vmatprep.subr.bf16.mxu0 %v352_v3  ;;  %p336_p4 = pnand %p335_p3, %p329_p0 }
  0x1e   :  { %300 = vmatpush3.bf16.xpose.msk.msra.mxu0 %vm398_vm1, %v298_v19 }
  0x1f   :  { %301 = vmatprep.subr.bf16.mxu0 %v352_v3 }
  0x26   :  { %304 = vmatpush3.bf16.xpose.msk.msra.mxu0 %vm398_vm1, %v302_v22 }
  0x27   :  { %305 = vmatprep.subr.bf16.mxu0 %v352_v3 }
  0x2e   :  { %308 = vmatpush3.bf16.xpose.msk.msra.mxu0 %vm398_vm1, %v306_v25 }
  0x2f   :  { %309 = vmatprep.subr.bf16.mxu0 %v352_v3 }
  0x36   :  { %312 = vmatpush3.bf16.xpose.msk.msra.mxu0 %vm398_vm1, %v310_v28 }
  0x37   :  { %313 = vmatprep.subr.bf16.mxu0 %v352_v3 }
  0x3e   :  { %316 = vmatpush3.bf16.xpose.msk.msra.mxu0 %vm398_vm1, %v314_v31 }
  0x45   :  { %283 = vmatmul.mubr.msk.f32.vlgmr.msra.gmra.mrb[0].mxu0 %vm46_vm0, %v39_v32 }
  0x85   :  { %v44_v33 = vpop.permute.xlu0 %43 }
  0x89   :  { %v193_v50 = vpop.permute.xlu1 %192 }
  0x8a   :  { %v198_v52 = vrot.slane %v193_v50, %v197_v48 }
  0x8b   :  { %v178_v41 = vpop.permute.xlu0 %177 }
 0x118   :  { %v164_v34 = vpop.f32.mrb[0].mxu0 }
 0x119   :  { %v165_v35 = vadd.f32 %v164_v34, %v44_v33  ;;  %v284_v36 = vpop.f32.mrb[1].mxu0 }
 0x11b   :  { %v232_v37 = vmul.f32 -1.442695, %v165_v35 }
 0x11d   :  { %324 = vpow2.f32 %v232_v37 }
 0x127   :  { %v325_v38 = vpop.eup %324 }
 0x128   :  { %v171_v39 = vadd.f32 1.0, %v325_v38 }
 0x12a   :  { %326 = vrcp.f32 %v171_v39 }
 0x134   :  { %v327_v40 = vpop.eup %326 }
 0x135   :  { %v180_v43 = vmul.f32 %v327_v40, %v178_v41 }
 0x137   :  { %v182_v44 = vsel %vm181_vm3, %v180_v43, 0.0 }
 0x138   :  { %v183_v46 = vrot.slane %v182_v44, 4 }
 0x13a   :  { %v184_v47 = vadd.f32 %v183_v46, %v182_v44 }
 0x13c   :  { %v185_v49 = vrot.slane %v184_v47, 2 }
 0x13e   :  { %v186_v51 = vadd.f32 %v185_v49, %v184_v47 }
 0x140   :  { %v187_v53 = vrot.slane %v186_v51, 1 }
 0x142   :  { %v188_v54 = vadd.f32 %v187_v53, %v186_v51 }
 0x144   :  { %v199_v55 = vadd.f32 %v198_v52, %v188_v54 }
 0x146   :  { %200 = vst [vmem:[#allocation3] sm:$0x1] %v199_v55 }
 0x147   :  { %339 = shalt.err (!%p336_p4)
}
 0x148   :  { %s340_s8 = scalar_lea.hbm %s487_s5, 16 }
 0x149   :  { %p341_p5 = scmp.ne.s32.totalorder %s487_s5, %s340_s8  ;;  %p344_p6 = scmp.lt.u32.totalorder %s340_s8, %s487_s5 }
 0x14b   :  { %p346_p7 = pnand %p344_p6, %p341_p5 }
 0x14d   :  { %349 = shalt.err (!%p346_p7)
}
 0x14e   :  { %210 = dma.vmem_to_hbm [thread:$0]  %s208_s1, 16, %s487_s5, [#allocation4]  }
 0x14f   :  { %350 = dma.done.wait [#allocation4], 16  }
 0x150   :  { %351 = vsyncadd [#allocation4], 4294967280 }
 0x151   :  { %214 = vsyncpa [#allocation4], 1 }

</bundles_post_ra>
